<compile_context>
chip_gen: v7x
topology: tpu7x:2x2x1
jax: 0.10.0
libtpu: 0.0.40
codegen_flags: <defaults>
</compile_context>

<pallas_src>
import functools

import jax
import jax.numpy as jnp
from jax import lax
from jax.experimental import pallas as pl
from jax.experimental.pallas import tpu as pltpu

LANE = 128
ACC_ROWS = 8                 # fixed-size accumulator slabs (one vreg tall)
MAX_TILE_ROWS = 4096         # 4096x128 f32 = 2 MiB per input block
_VMEM_LIMIT_BYTES = 48 * 1024 * 1024


def _round_up(x, m):
    return ((x + m - 1) // m) * m


def _device_profile():
    """Return (num_chunks, max_tile_rows) for the attached TPU generation."""
    kind = ""
    try:
        kind = jax.devices()[0].device_kind.lower()
    except Exception:
        pass
    # Chips with two TensorCores per Pallas device benefit from a 2-way
    # "parallel" chunk axis; single-TC chips (v5e, v6e) only pay for it.
    two_cores = any(tag in kind for tag in ("v4", "v5p", "v7", "tpu7"))
    return (2 if two_cores else 1), MAX_TILE_ROWS


def _focal_dice_l1_kernel(p_ref, t_ref, out_ref,
                          fl_acc, i_acc, pt_acc,
                          *, rows, tile_rows, steps_per_chunk,
                          gamma, alpha, w_focal, w_l1, beta,
                          needs_mask, assume_binary_targets,
                          assume_unit_interval):
    c = pl.program_id(0)                 # parallel chunk axis (per TensorCore)
    s = pl.program_id(1)                 # reduction axis within chunk
    steps = pl.num_programs(1)

    @pl.when(s == 0)
    def _():
        fl_acc[...] = jnp.zeros_like(fl_acc)
        i_acc[...] = jnp.zeros_like(i_acc)
        pt_acc[...] = jnp.zeros_like(pt_acc)

    k = tile_rows // ACC_ROWS

    def fold(x):
        # Fold a (tile_rows, LANE) tile into a fixed (8, LANE) slab.
        return x.reshape(k, ACC_ROWS, LANE).sum(axis=0)

    def accumulate(p, t):
        # --- Focal loss (focal weight baked in; mean taken in the wrapper) ---
        one_m_p = 1.0 - p
        logp = jnp.maximum(jnp.log(p), -100.0)          # F.binary_cross_entropy clamp
        log1mp = jnp.maximum(jnp.log(one_m_p), -100.0)
        bce = -(t * logp + (1.0 - t) * log1mp)
        is_pos = t > 0.5
        # alpha.gather(0, targets): target==0 -> alpha, target==1 -> 1-alpha
        at = jnp.where(is_pos, w_focal * (1.0 - alpha), w_focal * alpha)
        if assume_binary_targets:
            # Exact only for hard {0,1} targets (opt-in).
            pt = jnp.where(is_pos, p, one_m_p)
        else:
            pt = jnp.exp(-bce)
        om = 1.0 - pt
        g = float(gamma)
        if g == int(g) and 0 <= int(g) <= 4:
            gi = int(g)
            powt = jnp.ones_like(om) if gi == 0 else om
            for _ in range(max(gi - 1, 0)):
                powt = powt * om
        else:
            powt = jnp.power(om, g)
        focal = at * powt * bce

        # --- SmoothL1 (weight / 0.5 / beta constants baked in) --------------
        d = p - t
        if assume_unit_interval and beta >= 1.0:
            # probabilities & targets in [0,1] -> |p-t| <= 1 <= beta, so only
            # the quadratic branch of SmoothL1 can fire (exact, incl. |d|==beta).
            sl1 = (0.5 * w_l1 / beta) * (d * d)
        else:
            ad = jnp.abs(d)
            sl1 = jnp.where(ad < beta,
                            (0.5 * w_l1 / beta) * (d * d),
                            w_l1 * ad - (0.5 * beta * w_l1))

        fl_acc[...] += fold(focal + sl1)
        i_acc[...] += fold(p * t)
        pt_acc[...] += fold(p + t)

    if needs_mask:
        block_idx = c * steps_per_chunk + s       # logical (unclamped) block
        row0 = block_idx * tile_rows
        is_tail = row0 + tile_rows > rows         # overlaps / beyond the end

        @pl.when(jnp.logical_not(is_tail))
        def _():
            accumulate(p_ref[...].astype(jnp.float32),
                       t_ref[...].astype(jnp.float32))

        @pl.when(is_tail)
        def _():
            # Zero p/t BEFORE the log/exp chain so garbage tail rows (partial
            # last block / clamped out-of-range blocks) contribute exactly 0.
            row_ids = row0 + lax.broadcasted_iota(jnp.int32, (tile_rows, LANE), 0)
            valid = row_ids < rows
            accumulate(jnp.where(valid, p_ref[...].astype(jnp.float32), 0.0),
                       jnp.where(valid, t_ref[...].astype(jnp.float32), 0.0))
    else:
        accumulate(p_ref[...].astype(jnp.float32),
                   t_ref[...].astype(jnp.float32))

    @pl.when(s == steps - 1)
    def _():
        out_ref[0, 0:ACC_ROWS, :] = fl_acc[...]
        out_ref[0, ACC_ROWS:2 * ACC_ROWS, :] = i_acc[...]
        out_ref[0, 2 * ACC_ROWS:3 * ACC_ROWS, :] = pt_acc[...]


def focal_dice_l1_loss(pred, target, *, gamma=2.0, alpha=0.5,
                       weights=(1.0, 1.0, 1.0), smooth=1.0, beta=1.0,
                       assume_binary_targets=False, assume_unit_interval=True,
                       max_tile_rows=None, num_chunks=None):
    """Pallas implementation of FocalDiceL1Loss.forward (trainable_weights=False)."""
    n = pred.size
    dev_chunks, dev_tile = _device_profile()
    if num_chunks is None:
        num_chunks = dev_chunks
    if max_tile_rows is None:
        max_tile_rows = dev_tile

    # Flatten row-major to a lane-dense (rows, 128) slab in the input's native
    # dtype (no upcast copy).  Only pad when n is not a multiple of 128.
    p_flat = pred.reshape(-1)
    t_flat = target.reshape(-1)
    if n % LANE != 0:
        padded = _round_up(n, ACC_ROWS * LANE)      # tiny zero tail, rare path
        p_flat = jnp.pad(p_flat, (0, padded - n))
        t_flat = jnp.pad(t_flat, (0, padded - n))
    rows = p_flat.size // LANE
    p2 = p_flat.reshape(rows, LANE)
    t2 = t_flat.reshape(rows, LANE)

    # Row alignment for the block shape: 8 for 32-bit, 16 for 16-bit, 32 for 8-bit.
    min_itemsize = max(1, min(p2.dtype.itemsize, t2.dtype.itemsize))
    row_align = max(ACC_ROWS, 32 // min_itemsize)
    max_tile_rows = max(_round_up(int(max_tile_rows), row_align), row_align)

    tile_rows = min(max_tile_rows, _round_up(rows, row_align))
    total_blocks = pl.cdiv(rows, tile_rows)
    if total_blocks < num_chunks:
        num_chunks = 1
    steps_per_chunk = pl.cdiv(total_blocks, num_chunks)
    if num_chunks > 1:
        # Balance the block count evenly across the parallel chunks instead of
        # clamping a whole wasted (fully masked) block onto one TensorCore.
        nb = num_chunks * steps_per_chunk
        tile_rows = min(tile_rows, _round_up(pl.cdiv(rows, nb), row_align))
        total_blocks = pl.cdiv(rows, tile_rows)
        steps_per_chunk = pl.cdiv(total_blocks, num_chunks)
    covered_rows = num_chunks * steps_per_chunk * tile_rows
    needs_mask = covered_rows != rows
    last_block = total_blocks - 1

    def in_map(c, s):
        # Clamp so any fully out-of-range block re-reads the last valid block;
        # the kernel masks it to zero by logical row index.
        return (jnp.minimum(c * steps_per_chunk + s, last_block), 0)

    kernel = functools.partial(
        _focal_dice_l1_kernel,
        rows=rows, tile_rows=tile_rows, steps_per_chunk=steps_per_chunk,
        gamma=float(gamma), alpha=float(alpha),
        w_focal=float(weights[0]), w_l1=float(weights[2]),
        beta=float(beta), needs_mask=bool(needs_mask),
        assume_binary_targets=bool(assume_binary_targets),
        assume_unit_interval=bool(assume_unit_interval))

    partials = pl.pallas_call(
        kernel,
        out_shape=jax.ShapeDtypeStruct((num_chunks, 3 * ACC_ROWS, LANE),
                                       jnp.float32),
        grid_spec=pltpu.PrefetchScalarGridSpec(
            num_scalar_prefetch=0,
            grid=(num_chunks, steps_per_chunk),
            in_specs=[
                pl.BlockSpec((tile_rows, LANE), in_map),
                pl.BlockSpec((tile_rows, LANE), in_map),
            ],
            out_specs=pl.BlockSpec((1, 3 * ACC_ROWS, LANE),
                                   lambda c, s: (c, 0, 0)),
            scratch_shapes=[pltpu.VMEM((ACC_ROWS, LANE), jnp.float32)] * 3,
        ),
        compiler_params=pltpu.CompilerParams(
            dimension_semantics=("parallel", "arbitrary"),
            vmem_limit_bytes=_VMEM_LIMIT_BYTES),
    )(p2, t2)

    # Tiny final combine in plain JAX (num_chunks * 3 * 1024 floats).
    sums = partials.reshape(num_chunks, 3, ACC_ROWS * LANE).sum(axis=(0, 2))
    focal_plus_l1 = sums[0] / float(n)          # w0*mean(focal) + w2*mean(smoothL1)
    dice = 1.0 - (2.0 * sums[1] + float(smooth)) / (sums[2] + float(smooth))
    # TODO(synk): AutomaticWeightedLoss (trainable_weights=True) is a 3-scalar
    # reweighting of (focal, dice, l1); it would live in plain-JAX glue here.
    return focal_plus_l1 + float(weights[1]) * dice


def _reference(pred, target, *, gamma, alpha, weights, smooth=1.0, beta=1.0):
    """Pure-JAX reference mirroring the PyTorch module."""
    p = pred.astype(jnp.float32).reshape(-1)
    t = target.astype(jnp.float32).reshape(-1)
    bce = -(t * jnp.maximum(jnp.log(p), -100.0)
            + (1.0 - t) * jnp.maximum(jnp.log(1.0 - p), -100.0))
    at = jnp.where(t > 0.5, 1.0 - alpha, alpha)
    pt = jnp.exp(-bce)
    focal = jnp.mean(at * (1.0 - pt) ** gamma * bce)
    d = p - t
    ad = jnp.abs(d)
    l1 = jnp.mean(jnp.where(ad < beta, 0.5 * d * d / beta, ad - 0.5 * beta))
    inter = jnp.sum(p * t)
    dice = 1.0 - (2.0 * inter + smooth) / (jnp.sum(t) + jnp.sum(p) + smooth)
    return weights[0] * focal + weights[1] * dice + weights[2] * l1


if __name__ == "__main__":
    key = jax.random.PRNGKey(0)
    ks = jax.random.split(key, 6)
    gamma, alpha = 2.0, 0.25
    weights = (1.0, 1.0, 1.0)          # trainable_weights=False path

    def check(pred, target, *, rtol=1e-4, atol=1e-5, **kw):
        loss = jax.block_until_ready(
            focal_dice_l1_loss(pred, target, gamma=gamma, alpha=alpha,
                               weights=weights, **kw))
        ref = _reference(pred, target, gamma=gamma, alpha=alpha, weights=weights)
        assert jnp.allclose(loss, ref, rtol=rtol, atol=atol), (loss, ref, kw)

    # 1) Small NCHW case matching the module's typical inputs (single block).
    pred = jax.nn.sigmoid(jax.random.normal(ks[0], (2, 4, 16, 16), jnp.float32))
    targ = (jax.random.uniform(ks[1], (2, 4, 16, 16)) > 0.5).astype(jnp.float32)
    check(pred, targ)

    # 2) Larger case, default (device-profiled) tiling.
    pred2 = jax.nn.sigmoid(jax.random.normal(ks[2], (3, 4, 160, 160), jnp.float32))
    targ2 = (jax.random.uniform(ks[3], (3, 4, 160, 160)) > 0.5).astype(jnp.float32)
    check(pred2, targ2)

    # 3) Forced 2-chunk balanced split with a partial (masked) tail block.
    check(pred2, targ2, max_tile_rows=384, num_chunks=2)

    # 4) Forced single-chunk multi-step reduction with a partial tail block.
    check(pred2, targ2, max_tile_rows=256, num_chunks=1)

    # 5) n not a multiple of 128 (minimal tail-pad path).
    pred3 = jax.nn.sigmoid(jax.random.normal(ks[4], (2, 3, 15, 17), jnp.float32))
    targ3 = (jax.random.uniform(ks[5], (2, 3, 15, 17)) > 0.5).astype(jnp.float32)
    check(pred3, targ3)

    # 6) Native bf16 inputs (no wrapper upcast copy) + binary-target fast path,
    #    2-chunk exactly-balanced split.
    predb = pred2.astype(jnp.bfloat16)
    check(predb, targ2, rtol=5e-4, atol=5e-5,
          assume_binary_targets=True, max_tile_rows=512, num_chunks=2)

    print("KERNEL_OK")
</pallas_src>

<mosaic_0001>
module attributes {stable_mosaic.version = 11 : i64} {
  func.func @_focal_dice_l1_kernel(%arg0: i32, %arg1: i32, %arg2: memref<16x128xf32, #tpu.memory_space<vmem>>, %arg3: memref<16x128xf32, #tpu.memory_space<vmem>>, %arg4: memref<1x24x128xf32, #tpu.memory_space<vmem>>, %arg5: memref<8x128xf32, #tpu.memory_space<vmem>>, %arg6: memref<8x128xf32, #tpu.memory_space<vmem>>, %arg7: memref<8x128xf32, #tpu.memory_space<vmem>>) attributes {dimension_semantics = [#tpu.dimension_semantics<parallel>, #tpu.dimension_semantics<arbitrary>], iteration_bounds = array<i64: 1, 1>, scalar_prefetch = 0 : i64, scratch_operands = 3 : i64, tpu.core_type = #tpu.core_type<tc>, window_params = [{transform_indices = @transform_0, window_bounds = array<i64: 16, 128>}, {transform_indices = @transform_1, window_bounds = array<i64: 16, 128>}, {transform_indices = @transform_2, window_bounds = array<i64: 1, 24, 128>}]} {
    %c0_i32 = arith.constant 0 : i32
    %0 = arith.cmpi eq, %arg1, %c0_i32 : i32
    %1 = arith.extui %0 : i1 to i32
    %c0_i32_0 = arith.constant 0 : i32
    %2 = arith.cmpi ne, %1, %c0_i32_0 : i32
    scf.if %2 {
      %cst_31 = arith.constant 0.000000e+00 : f32
      %58 = vector.broadcast %cst_31 : f32 to vector<8x128xf32>
      %c0_32 = arith.constant 0 : index
      %c0_33 = arith.constant 0 : index
      %59 = vector.load %arg5[%c0_32, %c0_33] : memref<8x128xf32, #tpu.memory_space<vmem>>, vector<8x128xf32>
      tpu.vector_store %arg5[%c0_32, %c0_33], %58 {strides = array<i32>} : memref<8x128xf32, #tpu.memory_space<vmem>>, vector<8x128xf32>,
      %cst_34 = arith.constant 0.000000e+00 : f32
      %60 = vector.broadcast %cst_34 : f32 to vector<8x128xf32>
      %c0_35 = arith.constant 0 : index
      %c0_36 = arith.constant 0 : index
      %61 = vector.load %arg6[%c0_35, %c0_36] : memref<8x128xf32, #tpu.memory_space<vmem>>, vector<8x128xf32>
      tpu.vector_store %arg6[%c0_35, %c0_36], %60 {strides = array<i32>} : memref<8x128xf32, #tpu.memory_space<vmem>>, vector<8x128xf32>,
      %cst_37 = arith.constant 0.000000e+00 : f32
      %62 = vector.broadcast %cst_37 : f32 to vector<8x128xf32>
      %c0_38 = arith.constant 0 : index
      %c0_39 = arith.constant 0 : index
      %63 = vector.load %arg7[%c0_38, %c0_39] : memref<8x128xf32, #tpu.memory_space<vmem>>, vector<8x128xf32>
      tpu.vector_store %arg7[%c0_38, %c0_39], %62 {strides = array<i32>} : memref<8x128xf32, #tpu.memory_space<vmem>>, vector<8x128xf32>,
    } else {
    }
    %c0 = arith.constant 0 : index
    %c0_1 = arith.constant 0 : index
    %3 = vector.load %arg2[%c0, %c0_1] : memref<16x128xf32, #tpu.memory_space<vmem>>, vector<16x128xf32>
    %c0_2 = arith.constant 0 : index
    %c0_3 = arith.constant 0 : index
    %4 = vector.load %arg3[%c0_2, %c0_3] : memref<16x128xf32, #tpu.memory_space<vmem>>, vector<16x128xf32>
    %cst = arith.constant 1.000000e+00 : f32
    %5 = vector.broadcast %cst : f32 to vector<16x128xf32>
    %6 = arith.subf %5, %3 : vector<16x128xf32>
    %7 = math.log %3 : vector<16x128xf32>
    %cst_4 = arith.constant -1.000000e+02 : f32
    %8 = vector.broadcast %cst_4 : f32 to vector<16x128xf32>
    %9 = arith.maximumf %7, %8 : vector<16x128xf32>
    %10 = math.log %6 : vector<16x128xf32>
    %cst_5 = arith.constant -1.000000e+02 : f32
    %11 = vector.broadcast %cst_5 : f32 to vector<16x128xf32>
    %12 = arith.maximumf %10, %11 : vector<16x128xf32>
    %13 = arith.mulf %4, %9 : vector<16x128xf32>
    %cst_6 = arith.constant 1.000000e+00 : f32
    %14 = vector.broadcast %cst_6 : f32 to vector<16x128xf32>
    %15 = arith.subf %14, %4 : vector<16x128xf32>
    %16 = arith.mulf %15, %12 : vector<16x128xf32>
    %17 = arith.addf %13, %16 : vector<16x128xf32>
    %cst_7 = arith.constant 0.000000e+00 : f32
    %18 = vector.broadcast %cst_7 : f32 to vector<16x128xf32>
    %19 = arith.subf %18, %17 : vector<16x128xf32>
    %cst_8 = arith.constant 5.000000e-01 : f32
    %20 = vector.broadcast %cst_8 : f32 to vector<16x128xf32>
    %21 = arith.cmpf ogt, %4, %20 : vector<16x128xf32>
    %cst_9 = arith.constant 7.500000e-01 : f32
    %cst_10 = arith.constant 2.500000e-01 : f32
    %22 = vector.broadcast %cst_9 : f32 to vector<16x128xf32>
    %23 = vector.broadcast %cst_10 : f32 to vector<16x128xf32>
    %24 = arith.select %21, %22, %23 : vector<16x128xi1>, vector<16x128xf32>
    %cst_11 = arith.constant 0.000000e+00 : f32
    %25 = vector.broadcast %cst_11 : f32 to vector<16x128xf32>
    %26 = arith.subf %25, %19 : vector<16x128xf32>
    %27 = math.exp %26 : vector<16x128xf32>
    %cst_12 = arith.constant 1.000000e+00 : f32
    %28 = vector.broadcast %cst_12 : f32 to vector<16x128xf32>
    %29 = arith.subf %28, %27 : vector<16x128xf32>
    %30 = arith.mulf %29, %29 : vector<16x128xf32>
    %31 = arith.mulf %24, %30 : vector<16x128xf32>
    %32 = arith.mulf %31, %19 : vector<16x128xf32>
    %33 = arith.subf %3, %4 : vector<16x128xf32>
    %34 = arith.mulf %33, %33 : vector<16x128xf32>
    %cst_13 = arith.constant 5.000000e-01 : f32
    %35 = vector.broadcast %cst_13 : f32 to vector<16x128xf32>
    %36 = arith.mulf %35, %34 : vector<16x128xf32>
    %c0_14 = arith.constant 0 : index
    %c0_15 = arith.constant 0 : index
    %37 = vector.load %arg5[%c0_14, %c0_15] : memref<8x128xf32, #tpu.memory_space<vmem>>, vector<8x128xf32>
    %38 = arith.addf %32, %36 : vector<16x128xf32>
    %39 = vector.shape_cast %38 : vector<16x128xf32> to vector<2x8x128xf32>
    %cst_16 = arith.constant dense<0.000000e+00> : vector<8x128xf32>
    %40 = vector.multi_reduction <add>, %39, %cst_16 [0] : vector<2x8x128xf32> to vector<8x128xf32>
    %41 = arith.addf %37, %40 : vector<8x128xf32>
    %c0_17 = arith.constant 0 : index
    %c0_18 = arith.constant 0 : index
    %42 = vector.load %arg5[%c0_17, %c0_18] : memref<8x128xf32, #tpu.memory_space<vmem>>, vector<8x128xf32>
    tpu.vector_store %arg5[%c0_17, %c0_18], %41 {strides = array<i32>} : memref<8x128xf32, #tpu.memory_space<vmem>>, vector<8x128xf32>,
    %c0_19 = arith.constant 0 : index
    %c0_20 = arith.constant 0 : index
    %43 = vector.load %arg6[%c0_19, %c0_20] : memref<8x128xf32, #tpu.memory_space<vmem>>, vector<8x128xf32>
    %44 = arith.mulf %3, %4 : vector<16x128xf32>
    %45 = vector.shape_cast %44 : vector<16x128xf32> to vector<2x8x128xf32>
    %cst_21 = arith.constant dense<0.000000e+00> : vector<8x128xf32>
    %46 = vector.multi_reduction <add>, %45, %cst_21 [0] : vector<2x8x128xf32> to vector<8x128xf32>
    %47 = arith.addf %43, %46 : vector<8x128xf32>
    %c0_22 = arith.constant 0 : index
    %c0_23 = arith.constant 0 : index
    %48 = vector.load %arg6[%c0_22, %c0_23] : memref<8x128xf32, #tpu.memory_space<vmem>>, vector<8x128xf32>
    tpu.vector_store %arg6[%c0_22, %c0_23], %47 {strides = array<i32>} : memref<8x128xf32, #tpu.memory_space<vmem>>, vector<8x128xf32>,
    %c0_24 = arith.constant 0 : index
    %c0_25 = arith.constant 0 : index
    %49 = vector.load %arg7[%c0_24, %c0_25] : memref<8x128xf32, #tpu.memory_space<vmem>>, vector<8x128xf32>
    %50 = arith.addf %3, %4 : vector<16x128xf32>
    %51 = vector.shape_cast %50 : vector<16x128xf32> to vector<2x8x128xf32>
    %cst_26 = arith.constant dense<0.000000e+00> : vector<8x128xf32>
    %52 = vector.multi_reduction <add>, %51, %cst_26 [0] : vector<2x8x128xf32> to vector<8x128xf32>
    %53 = arith.addf %49, %52 : vector<8x128xf32>
    %c0_27 = arith.constant 0 : index
    %c0_28 = arith.constant 0 : index
    %54 = vector.load %arg7[%c0_27, %c0_28] : memref<8x128xf32, #tpu.memory_space<vmem>>, vector<8x128xf32>
    tpu.vector_store %arg7[%c0_27, %c0_28], %53 {strides = array<i32>} : memref<8x128xf32, #tpu.memory_space<vmem>>, vector<8x128xf32>,
    %c0_i32_29 = arith.constant 0 : i32
    %55 = arith.cmpi eq, %arg1, %c0_i32_29 : i32
    %56 = arith.extui %55 : i1 to i32
    %c0_i32_30 = arith.constant 0 : i32
    %57 = arith.cmpi ne, %56, %c0_i32_30 : i32
    scf.if %57 {
      %c0_31 = arith.constant 0 : index
      %c0_32 = arith.constant 0 : index
      %58 = vector.load %arg5[%c0_31, %c0_32] : memref<8x128xf32, #tpu.memory_space<vmem>>, vector<8x128xf32>
      %c0_33 = arith.constant 0 : index
      %c0_34 = arith.constant 0 : index
      %c0_35 = arith.constant 0 : index
      %59 = vector.load %arg4[%c0_33, %c0_34, %c0_35] : memref<1x24x128xf32, #tpu.memory_space<vmem>>, vector<1x8x128xf32>
      %60 = vector.shape_cast %59 : vector<1x8x128xf32> to vector<8x128xf32>
      %61 = vector.shape_cast %58 : vector<8x128xf32> to vector<1x8x128xf32>
      tpu.vector_store %arg4[%c0_33, %c0_34, %c0_35], %61 {strides = array<i32>} : memref<1x24x128xf32, #tpu.memory_space<vmem>>, vector<1x8x128xf32>,
      %c0_36 = arith.constant 0 : index
      %c0_37 = arith.constant 0 : index
      %62 = vector.load %arg6[%c0_36, %c0_37] : memref<8x128xf32, #tpu.memory_space<vmem>>, vector<8x128xf32>
      %c0_38 = arith.constant 0 : index
      %c8 = arith.constant 8 : index
      %c0_39 = arith.constant 0 : index
      %63 = vector.load %arg4[%c0_38, %c8, %c0_39] : memref<1x24x128xf32, #tpu.memory_space<vmem>>, vector<1x8x128xf32>
      %64 = vector.shape_cast %63 : vector<1x8x128xf32> to vector<8x128xf32>
      %65 = vector.shape_cast %62 : vector<8x128xf32> to vector<1x8x128xf32>
      tpu.vector_store %arg4[%c0_38, %c8, %c0_39], %65 {strides = array<i32>} : memref<1x24x128xf32, #tpu.memory_space<vmem>>, vector<1x8x128xf32>,
      %c0_40 = arith.constant 0 : index
      %c0_41 = arith.constant 0 : index
      %66 = vector.load %arg7[%c0_40, %c0_41] : memref<8x128xf32, #tpu.memory_space<vmem>>, vector<8x128xf32>
      %c0_42 = arith.constant 0 : index
      %c16 = arith.constant 16 : index
      %c0_43 = arith.constant 0 : index
      %67 = vector.load %arg4[%c0_42, %c16, %c0_43] : memref<1x24x128xf32, #tpu.memory_space<vmem>>, vector<1x8x128xf32>
      %68 = vector.shape_cast %67 : vector<1x8x128xf32> to vector<8x128xf32>
      %69 = vector.shape_cast %66 : vector<8x128xf32> to vector<1x8x128xf32>
      tpu.vector_store %arg4[%c0_42, %c16, %c0_43], %69 {strides = array<i32>} : memref<1x24x128xf32, #tpu.memory_space<vmem>>, vector<1x8x128xf32>,
    } else {
    }
    return
  }
  func.func @transform_0(%arg0: i32, %arg1: i32) -> (i32, i32) {
    %c1_i32 = arith.constant 1 : i32
    %0 = arith.muli %arg0, %c1_i32 : i32
    %1 = arith.addi %0, %arg1 : i32
    %c0_i32 = arith.constant 0 : i32
    %2 = arith.minsi %1, %c0_i32 : i32
    %c0_i32_0 = arith.constant 0 : i32
    %c0_i32_1 = arith.constant 0 : i32
    return %2, %c0_i32_0 : i32, i32
  }
  func.func @transform_1(%arg0: i32, %arg1: i32) -> (i32, i32) {
    %c1_i32 = arith.constant 1 : i32
    %0 = arith.muli %arg0, %c1_i32 : i32
    %1 = arith.addi %0, %arg1 : i32
    %c0_i32 = arith.constant 0 : i32
    %2 = arith.minsi %1, %c0_i32 : i32
    %c0_i32_0 = arith.constant 0 : i32
    %c0_i32_1 = arith.constant 0 : i32
    return %2, %c0_i32_0 : i32, i32
  }
  func.func @transform_2(%arg0: i32, %arg1: i32) -> (i32, i32, i32) {
    %c0_i32 = arith.constant 0 : i32
    %c0_i32_0 = arith.constant 0 : i32
    %c0_i32_1 = arith.constant 0 : i32
    return %arg0, %c0_i32, %c0_i32_0 : i32, i32, i32
  }
}

</mosaic_0001>

<bundles_post_ra>
// kernel: tpu_custom_call.1
= control target key start
LH: loop header
LB: loop body
LE: loop exit
PB: predicated region body
PF: predicated region fallthrough
CT: control target
= control target key end

     0   :  { %7 = vsyncpa [#allocation6], 0  ;;  %s324_s0 = inlined_call_operand.hbm [shape: f32[16,128], index: 0, kind: input, shape index: {}]   ;;  %s325_s1 = inlined_call_operand.hbm [shape: f32[16,128], index: 1, kind: input, shape index: {}]   ;;  %s326_s2 = inlined_call_operand.hbm [shape: f32[1,24,128], index: 2, kind: output, shape index: {}]  }
   0x1   :  { %8 = vsyncpa [#allocation9], 0 }
   0x2   :  { %9 = vsyncpa [#allocation7], 0  ;;  %s258_s9 = smov [#allocation5]   ;;  %s186_s13 = scalar_lea.hbm %s324_s0, 256 }
   0x3   :  { %s21_s10 = sshll.u32 %s258_s9, 4  ;;  %p187_p0 = scmp.ne.s32.totalorder %s324_s0, %s186_s13  ;;  %s22_s10 = int_to_ptr.vmem [resolvable:$true] %s21_s10 }
   0x4   :  { %p190_p1 = scmp.lt.u32.totalorder %s186_s13, %s324_s0 }
   0x6   :  { %p192_p2 = pnand %p190_p1, %p187_p0 }
   0x8   :  { %195 = shalt.err (!%p192_p2)
}
   0x9   :  { %s196_s18 = scalar_lea.vmem %s22_s10, 256  ;;  %p201_p4 = scmp.lt.s32.totalorder %s22_s10, %s22_s10 }
   0xa   :  { %p197_p3 = scmp.ne.s32.totalorder %s22_s10, %s196_s18  ;;  %p202_p5 = scmp.lt.s32.totalorder %s196_s18, %s196_s18 }
   0xc   :  { %p203_p6 = por %p202_p5, %p201_p4 }
   0xe   :  { %p204_p7 = pnand %p203_p6, %p197_p3 }
  0x10   :  { %207 = shalt.err (!%p204_p7)
}
  0x11   :  { %s259_s19 = smov 128   ;;  %s260_s20 = smov 8  }
  0x12   :  { %27 = dma.hbm_to_vmem [thread:$0]  %s324_s0, 256, %s22_s10, [#allocation6], %s259_s19, %s259_s19, %s260_s20  }
  0x13   :  { %s261_s23 = smov [#allocation8]   ;;  %s208_s27 = scalar_lea.hbm %s325_s1, 256 }
  0x14   :  { %s39_s24 = sshll.u32 %s261_s23, 4  ;;  %p209_p8 = scmp.ne.s32.totalorder %s325_s1, %s208_s27  ;;  %s40_s24 = int_to_ptr.vmem [resolvable:$true] %s39_s24 }
  0x15   :  { %p212_p9 = scmp.lt.u32.totalorder %s208_s27, %s325_s1 }
  0x17   :  { %p214_p10 = pnand %p212_p9, %p209_p8 }
  0x19   :  { %217 = shalt.err (!%p214_p10)
}
  0x1a   :  { %s218_s4 = scalar_lea.vmem %s40_s24, 256  ;;  %p223_p12 = scmp.lt.s32.totalorder %s40_s24, %s40_s24 }
  0x1b   :  { %p219_p11 = scmp.ne.s32.totalorder %s40_s24, %s218_s4  ;;  %p224_p13 = scmp.lt.s32.totalorder %s218_s4, %s218_s4 }
  0x1d   :  { %p225_p0 = por %p224_p13, %p223_p12 }
  0x1f   :  { %p226_p1 = pnand %p225_p0, %p219_p11 }
  0x21   :  { %229 = shalt.err (!%p226_p1)
}
  0x22   :  { %45 = dma.hbm_to_vmem [thread:$0]  %s325_s1, 256, %s40_s24, [#allocation9], %s259_s19, %s259_s19, %s260_s20  }
  0x23   :  { %252 = dma.done.wait [#allocation6], 256  }
  0x24   :  { %253 = vsyncadd [#allocation6], 4294967040 }
  0x25   :  { %254 = dma.done.wait [#allocation9], 256  }
  0x26   :  { %255 = vsyncadd [#allocation9], 4294967040  ;;  %v67_v0 = vld [vmem:[#allocation5] sm:$0xff]  ;;  %v68_v1 = vld [vmem:[#allocation5 + $0x8] sm:$0xff]  ;;  %v262_v44 = vmov 0.25   ;;  %s263_s1 = smov [#allocation10]  }
  0x27   :  { %v71_v2 = vsub.f32 1.0, %v67_v0  ;;  %v72_v3 = vsub.f32 1.0, %v68_v1  ;;  %174 = vlog2.f32 %v67_v0  ;;  %v69_v4 = vld [vmem:[#allocation8] sm:$0xff]  ;;  %v70_v5 = vld [vmem:[#allocation8 + $0x8] sm:$0xff]  ;;  %s151_s6 = sshll.u32 %s263_s1, 4  ;;  %s152_s6 = int_to_ptr.vmem [resolvable:$true] %s151_s6 }
  0x28   :  { %176 = vlog2.f32 %v68_v1  ;;  %v126_v6 = vmul.f32 %v69_v4, %v67_v0  ;;  %v127_v7 = vmul.f32 %v70_v5, %v68_v1  ;;  %v132_v8 = vadd.f32 %v69_v4, %v67_v0  ;;  %s230_s7 = scalar_lea.vmem %s152_s6, 384  ;;  %p235_p3 = scmp.lt.s32.totalorder %s152_s6, %s152_s6 }
  0x29   :  { %178 = vlog2.f32 %v71_v2  ;;  %v133_v9 = vadd.f32 %v70_v5, %v68_v1  ;;  %v87_v20 = vsub.f32 1.0, %v69_v4  ;;  %v88_v23 = vsub.f32 1.0, %v70_v5  ;;  %p231_p2 = scmp.ne.s32.totalorder %s152_s6, %s230_s7  ;;  %p236_p4 = scmp.lt.s32.totalorder %s230_s7, %s230_s7 }
  0x2a   :  { %180 = vlog2.f32 %v72_v3  ;;  %v128_v10 = vadd.f32 %v127_v7, %v126_v6  ;;  %v113_v38 = vsub.f32 %v67_v0, %v69_v4  ;;  %v114_v39 = vsub.f32 %v68_v1, %v70_v5 }
  0x2b   :  { %v134_v11 = vadd.f32 %v133_v9, %v132_v8  ;;  %vm95_vm0 = vcmp.gt.f32.partialorder %v69_v4, 0.5  ;;  %vm96_vm1 = vcmp.gt.f32.partialorder %v70_v5, 0.5  ;;  %p237_p5 = por %p236_p4, %p235_p3 }
  0x2c   :  { %143 = vst [vmem:[#allocation10 + $0x8] sm:$0xff] %v128_v10  ;;  %v115_v43 = vmul.f32 %v113_v38, %v113_v38  ;;  %v97_v45 = vsel %vm95_vm0, 0.75, %v262_v44  ;;  %v116_v47 = vmul.f32 %v114_v39, %v114_v39  ;;  %v98_v48 = vsel %vm96_vm1, 0.75, %v262_v44 }
  0x2d   :  { %145 = vst [vmem:[#allocation10 + $0x10] sm:$0xff] %v134_v11  ;;  %p238_p6 = pnand %p237_p5, %p231_p2 }
  0x2e   :  { %v117_v52 = vmul.f32 0.5, %v115_v43  ;;  %v118_v54 = vmul.f32 0.5, %v116_v47 }
  0x31   :  { %v175_v12 = vpop.eup %174 }
  0x32   :  { %v177_v13 = vpop.eup %176  ;;  %v74_v14 = vmul.f32 0.6931472, %v175_v12 }
  0x33   :  { %v179_v15 = vpop.eup %178  ;;  %v76_v16 = vmul.f32 0.6931472, %v177_v13 }
  0x34   :  { %v181_v17 = vpop.eup %180  ;;  %v77_v18 = vmax.f32 %v74_v14, -100.0  ;;  %v80_v19 = vmul.f32 0.6931472, %v179_v15 }
  0x35   :  { %v78_v21 = vmax.f32 %v76_v16, -100.0  ;;  %v82_v22 = vmul.f32 0.6931472, %v181_v17 }
  0x36   :  { %v83_v24 = vmax.f32 %v80_v19, -100.0  ;;  %v85_v25 = vmul.f32 %v77_v18, %v69_v4 }
  0x37   :  { %v84_v26 = vmax.f32 %v82_v22, -100.0  ;;  %v86_v27 = vmul.f32 %v78_v21, %v70_v5 }
  0x38   :  { %v89_v28 = vmul.f32 %v87_v20, %v83_v24 }
  0x39   :  { %v90_v29 = vmul.f32 %v88_v23, %v84_v26 }
  0x3a   :  { %v91_v30 = vadd.f32 %v89_v28, %v85_v25 }
  0x3b   :  { %v92_v31 = vadd.f32 %v90_v29, %v86_v27 }
  0x3c   :  { %v93_v32 = vsub.f32 0.0, %v91_v30 }
  0x3d   :  { %v94_v33 = vsub.f32 0.0, %v92_v31 }
  0x3e   :  { %v99_v34 = vsub.f32 0.0, %v93_v32 }
  0x3f   :  { %v100_v35 = vsub.f32 0.0, %v94_v33 }
  0x40   :  { %v101_v36 = vmul.f32 1.442695, %v99_v34 }
  0x41   :  { %v103_v37 = vmul.f32 1.442695, %v100_v35 }
  0x42   :  { %182 = vpow2.f32 %v101_v36 }
  0x43   :  { %184 = vpow2.f32 %v103_v37 }
  0x4c   :  { %v183_v40 = vpop.eup %182 }
  0x4d   :  { %v185_v41 = vpop.eup %184  ;;  %v105_v42 = vsub.f32 1.0, %v183_v40 }
  0x4e   :  { %v106_v46 = vsub.f32 1.0, %v185_v41 }
  0x4f   :  { %v107_v49 = vmul.f32 %v105_v42, %v105_v42 }
  0x50   :  { %v108_v50 = vmul.f32 %v106_v46, %v106_v46 }
  0x51   :  { %v109_v51 = vmul.f32 %v107_v49, %v97_v45 }
  0x52   :  { %v110_v53 = vmul.f32 %v108_v50, %v98_v48 }
  0x53   :  { %v111_v55 = vmul.f32 %v109_v51, %v93_v32 }
  0x54   :  { %v112_v56 = vmul.f32 %v110_v53, %v94_v33 }
  0x55   :  { %v120_v57 = vadd.f32 %v117_v52, %v111_v55 }
  0x56   :  { %v121_v58 = vadd.f32 %v118_v54, %v112_v56 }
  0x58   :  { %v122_v59 = vadd.f32 %v121_v58, %v120_v57 }
  0x5a   :  { %141 = vst [vmem:[#allocation10] sm:$0xff] %v122_v59 }
  0x5b   :  { %241 = shalt.err (!%p238_p6)
}
  0x5c   :  { %s242_s10 = scalar_lea.hbm %s326_s2, 384 }
  0x5d   :  { %p243_p7 = scmp.ne.s32.totalorder %s326_s2, %s242_s10  ;;  %p246_p8 = scmp.lt.u32.totalorder %s242_s10, %s326_s2 }
  0x5f   :  { %p248_p9 = pnand %p246_p8, %p243_p7 }
  0x61   :  { %251 = shalt.err (!%p248_p9)
}
  0x62   :  { %157 = dma.vmem_to_hbm [thread:$0]  %s152_s6, 384, %s326_s2, [#allocation7], %s259_s19, %s259_s19, %s260_s20  }
  0x63   :  { %256 = dma.done.wait [#allocation7], 384  }
  0x64   :  { %257 = vsyncadd [#allocation7], 4294966912 }
  0x65   :  { %161 = vsyncpa [#allocation6], 1 }
  0x66   :  { %162 = vsyncpa [#allocation9], 1 }
  0x67   :  { %163 = vsyncpa [#allocation7], 1 }

</bundles_post_ra>
